<compile_context>
chip_gen: v7x
topology: tpu7x:2x2x1
jax: 0.10.0
libtpu: 0.0.40
codegen_flags: <defaults>
</compile_context>

<pallas_src>
import functools

import jax
import jax.numpy as jnp
from jax.experimental import pallas as pl
from jax.experimental.pallas import tpu as pltpu


def _round_up(x, m):
    return ((x + m - 1) // m) * m


# ----------------------------- hardware planning ------------------------------

def _vmem_plan():
    """(vmem_limit_bytes for CompilerParams, tile-sizing budget in bytes)."""
    try:
        cap = int(getattr(pltpu.get_tpu_info(), "vmem_capacity_bytes"))
    except Exception:  # interpret mode / non-TPU backend
        cap = 64 << 20  # conservative: v7x per-TensorCore VMEM
    vmem_limit = min(int(cap * 0.70), 100 << 20)   # headroom for internal scratch
    budget = int(vmem_limit * 0.85)                # tile sizing stays under limit
    return vmem_limit, budget


def _tensorcores_per_chip():
    try:
        kind = jax.devices()[0].device_kind.lower()
    except Exception:
        return 1
    return 2 if ("v7" in kind or "7x" in kind) else 1


def _choose_feature_tile(B, E, itemsize, budget_bytes, min_stripes=1,
                         max_cols_per_step=None):
    """Lane-dense feature stripe width for the fused single-pass kernel.

    Returns None when even a [B, 128] column exceeds the VMEM budget (the
    caller then takes the two-pass path).
    """
    e128 = _round_up(E, 128)
    # Bytes per feature column: double-buffered in + out at I/O dtype
    # (2*2*itemsize) plus ~3 live f32 temporaries (x, centered, result).
    per_col = B * (4 * itemsize + 12)
    if per_col * min(E, 128) > budget_bytes:
        return None
    fit = max(128, (budget_bytes // per_col) // 128 * 128)
    # Target ~4 MiB of x per grid step so per-step overhead is amortized.
    target = max(128, ((4 << 20) // max(1, B * itemsize)) // 128 * 128)
    te = min(e128, fit, target)
    if max_cols_per_step is not None:
        te = min(te, max(128, _round_up(max_cols_per_step, 128)))
    if min_stripes > 1 and e128 >= min_stripes * 128:
        te = min(te, _round_up(pl.cdiv(e128, min_stripes), 128))
    te = max(te, 128)
    if te >= E:
        te = E          # full-width block: no 128 alignment needed, grid of 1+
    return te


# --------------------------------- kernels ------------------------------------

def _dice_fused_kernel(x_ref, alpha_ref, gamma_ref, beta_ref, o_ref, *, eps, inv_b):
    """Full batch resident per feature stripe: stats + activation in one pass."""
    x = x_ref[...].astype(jnp.float32)                            # [B, TE]

    # BatchNorm1d (training mode): per-feature batch mean / biased variance.
    # Two-pass (subtract-mean) variance: x is already resident, so the extra
    # VALU pass is cheap and avoids E[x^2]-mean^2 cancellation.
    mean = jnp.sum(x, axis=0, keepdims=True) * inv_b              # [1, TE]
    centered = x - mean
    var = jnp.sum(centered * centered, axis=0, keepdims=True) * inv_b

    scale = jax.lax.rsqrt(var + eps) * gamma_ref[...]             # [1, TE]
    # sigmoid(bn) = 0.5*tanh(0.5*bn) + 0.5 with bn = centered*scale + beta.
    t = jnp.tanh(centered * (0.5 * scale) + 0.5 * beta_ref[...])  # [B, TE]

    alpha = alpha_ref[...]
    c0 = 0.5 * (1.0 + alpha)        # alpha + (1-alpha)*0.5
    c1 = 0.5 * (1.0 - alpha)        # (1-alpha)*0.5
    o_ref[...] = (x * (c0 + c1 * t)).astype(o_ref.dtype)


def _dice_stats_kernel(x_ref, sum_ref, sq_ref, *, B, tb):
    """Phase 1 of the large-B path: accumulate per-feature sum / sum-of-squares."""
    b = pl.program_id(1)

    @pl.when(b == 0)
    def _():
        sum_ref[...] = jnp.zeros_like(sum_ref)
        sq_ref[...] = jnp.zeros_like(sq_ref)

    x = x_ref[...].astype(jnp.float32)                            # [tb, TE]
    rows = jax.lax.broadcasted_iota(jnp.int32, x.shape, 0)
    x = jnp.where(rows < (B - b * tb), x, 0.0)                    # mask ragged rows
    sum_ref[...] += jnp.sum(x, axis=0, keepdims=True)
    sq_ref[...] += jnp.sum(x * x, axis=0, keepdims=True)


def _dice_apply_kernel(x_ref, hs_ref, hb_ref, c0_ref, c1_ref, o_ref):
    """Phase 2 of the large-B path: out = x * (c0 + c1 * tanh(x*hs + hb))."""
    x = x_ref[...].astype(jnp.float32)
    t = jnp.tanh(x * hs_ref[...] + hb_ref[...])
    o_ref[...] = (x * (c0_ref[...] + c1_ref[...] * t)).astype(o_ref.dtype)


# --------------------------------- wrappers ------------------------------------

def _dice_single_pass(x, alpha2, gamma2, beta2, te, eps, vmem_limit):
    B, E = x.shape
    itemsize = jnp.dtype(x.dtype).itemsize
    grid = (pl.cdiv(E, te),)
    kernel = functools.partial(_dice_fused_kernel, eps=eps, inv_b=1.0 / B)
    cost = pl.CostEstimate(flops=int(10 * B * E),
                           transcendentals=int(B * E),
                           bytes_accessed=int(2 * B * E * itemsize))
    return pl.pallas_call(
        kernel,
        out_shape=jax.ShapeDtypeStruct((B, E), x.dtype),
        grid_spec=pltpu.PrefetchScalarGridSpec(
            num_scalar_prefetch=0,
            grid=grid,
            in_specs=[
                pl.BlockSpec((B, te), lambda j: (0, j)),
                pl.BlockSpec((1, te), lambda j: (0, j)),
                pl.BlockSpec((1, te), lambda j: (0, j)),
                pl.BlockSpec((1, te), lambda j: (0, j)),
            ],
            out_specs=pl.BlockSpec((B, te), lambda j: (0, j)),
        ),
        compiler_params=pltpu.CompilerParams(
            dimension_semantics=("parallel",),
            vmem_limit_bytes=vmem_limit,
        ),
        cost_estimate=cost,
    )(x, alpha2, gamma2, beta2)


def _dice_two_pass(x, alpha2, gamma2, beta2, eps, vmem_limit,
                   max_rows_per_step=None, max_cols_per_step=None):
    """Large-B fallback: stats accumulation pass + streaming apply pass."""
    B, E = x.shape
    itemsize = jnp.dtype(x.dtype).itemsize

    e128 = _round_up(E, 128)
    te = min(e128, 512)
    if max_cols_per_step is not None:
        te = min(te, max(128, _round_up(max_cols_per_step, 128)))
    if te >= E:
        te = E
    tb = max(8, ((1 << 20) // max(1, te * itemsize)) // 8 * 8)  # ~1 MiB of x/step
    if max_rows_per_step is not None:
        tb = min(tb, max(8, _round_up(max_rows_per_step, 8)))
    if tb >= B:
        tb = B

    ge, gb = pl.cdiv(E, te), pl.cdiv(B, tb)

    # Phase 1: per-feature sum / sum-sq (reduction over B, marked "arbitrary").
    stats_kernel = functools.partial(_dice_stats_kernel, B=B, tb=tb)
    s, sq = pl.pallas_call(
        stats_kernel,
        out_shape=(jax.ShapeDtypeStruct((1, E), jnp.float32),
                   jax.ShapeDtypeStruct((1, E), jnp.float32)),
        grid_spec=pltpu.PrefetchScalarGridSpec(
            num_scalar_prefetch=0,
            grid=(ge, gb),
            in_specs=[pl.BlockSpec((tb, te), lambda e, b: (b, e))],
            out_specs=(pl.BlockSpec((1, te), lambda e, b: (0, e)),
                       pl.BlockSpec((1, te), lambda e, b: (0, e))),
        ),
        compiler_params=pltpu.CompilerParams(
            dimension_semantics=("parallel", "arbitrary"),
            vmem_limit_bytes=vmem_limit,
        ),
    )(x)

    # Tiny [1, E] folds in plain JAX (negligible).
    inv_b = 1.0 / B
    mean = s * inv_b
    # One-pass variance here (x is streamed); guarded against cancellation.
    var = jnp.maximum(sq * inv_b - mean * mean, 0.0)
    scale = jax.lax.rsqrt(var + eps) * gamma2
    hs = 0.5 * scale
    hb = 0.5 * (beta2 - mean * scale)
    c0 = 0.5 * (1.0 + alpha2)
    c1 = 0.5 * (1.0 - alpha2)

    cost = pl.CostEstimate(flops=int(8 * B * E),
                           transcendentals=int(B * E),
                           bytes_accessed=int(2 * B * E * itemsize))
    return pl.pallas_call(
        _dice_apply_kernel,
        out_shape=jax.ShapeDtypeStruct((B, E), x.dtype),
        grid_spec=pltpu.PrefetchScalarGridSpec(
            num_scalar_prefetch=0,
            grid=(gb, ge),
            in_specs=[pl.BlockSpec((tb, te), lambda b, e: (b, e)),
                      pl.BlockSpec((1, te), lambda b, e: (0, e)),
                      pl.BlockSpec((1, te), lambda b, e: (0, e)),
                      pl.BlockSpec((1, te), lambda b, e: (0, e)),
                      pl.BlockSpec((1, te), lambda b, e: (0, e))],
            out_specs=pl.BlockSpec((tb, te), lambda b, e: (b, e)),
        ),
        compiler_params=pltpu.CompilerParams(
            dimension_semantics=("parallel", "parallel"),
            vmem_limit_bytes=vmem_limit,
        ),
        cost_estimate=cost,
    )(x, hs, hb, c0, c1)


def dice_forward(x, alpha, gamma, beta, *, epsilon=1e-8, force_two_pass=False,
                 max_rows_per_step=None, max_cols_per_step=None):
    """Dice, dim=2 case. x: [B, E]; alpha/gamma/beta: [E]."""
    B, E = x.shape
    itemsize = jnp.dtype(x.dtype).itemsize
    vmem_limit, budget = _vmem_plan()

    alpha2 = alpha.reshape(1, E).astype(jnp.float32)
    gamma2 = gamma.reshape(1, E).astype(jnp.float32)
    beta2 = beta.reshape(1, E).astype(jnp.float32)

    te = None
    if not force_two_pass:
        min_stripes = 2 if _tensorcores_per_chip() >= 2 else 1
        te = _choose_feature_tile(B, E, itemsize, budget, min_stripes,
                                  max_cols_per_step)
    if te is None:
        return _dice_two_pass(x, alpha2, gamma2, beta2, epsilon, vmem_limit,
                              max_rows_per_step=max_rows_per_step,
                              max_cols_per_step=max_cols_per_step)
    return _dice_single_pass(x, alpha2, gamma2, beta2, te, epsilon, vmem_limit)


def dice_forward_3d(x, alpha, gamma, beta, *, epsilon=1e-8, **kwargs):
    """Dice, dim=3 case. x: [B, N, E]; alpha (stored [E, 1] in the module) as [E]."""
    B, N, E = x.shape
    out2d = dice_forward(x.reshape(B * N, E), alpha, gamma, beta,
                         epsilon=epsilon, **kwargs)
    return out2d.reshape(B, N, E)


# ----------------------------- pure-JAX references -----------------------------

def dice_reference(x, alpha, gamma, beta, *, epsilon=1e-8):
    xf = x.astype(jnp.float32)
    mean = jnp.mean(xf, axis=0, keepdims=True)
    var = jnp.mean((xf - mean) ** 2, axis=0, keepdims=True)
    bn = (xf - mean) * jax.lax.rsqrt(var + epsilon) * gamma + beta
    x_p = jax.nn.sigmoid(bn)
    return (alpha * (1.0 - x_p) * xf + x_p * xf).astype(x.dtype)


def dice_reference_3d(x, alpha, gamma, beta, *, epsilon=1e-8):
    xf = x.astype(jnp.float32)
    xt = jnp.transpose(xf, (0, 2, 1))                              # [B, E, N]
    mean = jnp.mean(xt, axis=(0, 2), keepdims=True)
    var = jnp.mean((xt - mean) ** 2, axis=(0, 2), keepdims=True)
    bn = (xt - mean) * jax.lax.rsqrt(var + epsilon) * gamma[None, :, None] \
        + beta[None, :, None]
    x_p = jax.nn.sigmoid(bn)
    out = alpha[None, :, None] * (1.0 - x_p) * xt + x_p * xt
    return jnp.transpose(out, (0, 2, 1)).astype(x.dtype)


# TODO(synk): BatchNorm1d running_mean/running_var buffer updates (training-mode
# side effect) are not modeled; they do not affect the forward output.

if __name__ == "__main__":
    key = jax.random.PRNGKey(0)
    k1, k2, k3, k4, k5, k6, k7 = jax.random.split(key, 7)
    TOL = dict(atol=1e-4, rtol=1e-4)

    # Case 1: module-default init (dim=2): alpha=0, gamma=1, beta=0.
    B, E = 8, 32
    x = jax.random.normal(k1, (B, E), dtype=jnp.float32)
    alpha0 = jnp.zeros((E,), jnp.float32)
    gamma0 = jnp.ones((E,), jnp.float32)
    beta0 = jnp.zeros((E,), jnp.float32)
    out = jax.block_until_ready(dice_forward(x, alpha0, gamma0, beta0))
    ref = dice_reference(x, alpha0, gamma0, beta0)
    assert out.shape == x.shape and out.dtype == x.dtype
    assert jnp.allclose(out, ref, **TOL), "case1 mismatch"

    # Case 2: wider E with non-trivial parameters (single fused pass).
    B2, E2 = 16, 640
    x2 = jax.random.normal(k2, (B2, E2), jnp.float32) * 2.0 + 0.5
    a2 = 0.1 * jax.random.normal(k3, (E2,), jnp.float32)
    g2 = 1.0 + 0.1 * jax.random.normal(k4, (E2,), jnp.float32)
    b2 = 0.1 * jax.random.normal(k5, (E2,), jnp.float32)
    out2 = jax.block_until_ready(dice_forward(x2, a2, g2, b2))
    ref2 = dice_reference(x2, a2, g2, b2)
    assert jnp.allclose(out2, ref2, **TOL), "case2 mismatch"

    # Case 3: non-128-multiple E with forced multi-stripe grid (ragged stripe).
    B3, E3 = 24, 300
    x3 = jax.random.normal(k6, (B3, E3), jnp.float32) * 1.5
    a3 = 0.2 * jax.random.normal(k3, (E3,), jnp.float32)
    g3 = 1.0 + 0.1 * jax.random.normal(k4, (E3,), jnp.float32)
    b3 = 0.1 * jax.random.normal(k5, (E3,), jnp.float32)
    out3 = jax.block_until_ready(
        dice_forward(x3, a3, g3, b3, max_cols_per_step=128))
    ref3 = dice_reference(x3, a3, g3, b3)
    assert jnp.allclose(out3, ref3, **TOL), "case3 mismatch"

    # Case 4: dim=3 layout [batch, num_features, embedding].
    B4, N4, E4 = 4, 6, 32
    x4 = jax.random.normal(k7, (B4, N4, E4), jnp.float32)
    out4 = jax.block_until_ready(dice_forward_3d(x4, alpha0, gamma0, beta0))
    ref4 = dice_reference_3d(x4, alpha0, gamma0, beta0)
    assert out4.shape == x4.shape
    assert jnp.allclose(out4, ref4, **TOL), "case4 mismatch"

    # Case 5: large-B two-pass fallback (stats accumulation + streaming apply),
    # exercised at small scale by forcing the path and a small row tile.
    B5, E5 = 300, 200
    x5 = jax.random.normal(k2, (B5, E5), jnp.float32) * 1.5
    a5 = 0.1 * jax.random.normal(k3, (E5,), jnp.float32)
    g5 = 1.0 + 0.1 * jax.random.normal(k4, (E5,), jnp.float32)
    b5 = 0.1 * jax.random.normal(k5, (E5,), jnp.float32)
    out5 = jax.block_until_ready(
        dice_forward(x5, a5, g5, b5, force_two_pass=True, max_rows_per_step=128))
    ref5 = dice_reference(x5, a5, g5, b5)
    assert jnp.allclose(out5, ref5, **TOL), "case5 (two-pass) mismatch"

    print("KERNEL_OK")
</pallas_src>

<mosaic_0001>
module attributes {stable_mosaic.version = 11 : i64} {
  func.func @_dice_fused_kernel(%arg0: i32, %arg1: memref<8x32xf32, #tpu.memory_space<vmem>>, %arg2: memref<1x32xf32, #tpu.memory_space<vmem>>, %arg3: memref<1x32xf32, #tpu.memory_space<vmem>>, %arg4: memref<1x32xf32, #tpu.memory_space<vmem>>, %arg5: memref<8x32xf32, #tpu.memory_space<vmem>>) attributes {dimension_semantics = [#tpu.dimension_semantics<parallel>], iteration_bounds = array<i64: 1>, scalar_prefetch = 0 : i64, scratch_operands = 0 : i64, tpu.core_type = #tpu.core_type<tc>, window_params = [{transform_indices = @transform_0, window_bounds = array<i64: 8, 32>}, {transform_indices = @transform_1, window_bounds = array<i64: 1, 32>}, {transform_indices = @transform_2, window_bounds = array<i64: 1, 32>}, {transform_indices = @transform_3, window_bounds = array<i64: 1, 32>}, {transform_indices = @transform_4, window_bounds = array<i64: 8, 32>}]} {
    %c0 = arith.constant 0 : index
    %c0_0 = arith.constant 0 : index
    %0 = vector.load %arg1[%c0, %c0_0] : memref<8x32xf32, #tpu.memory_space<vmem>>, vector<8x32xf32>
    %cst = arith.constant dense<0.000000e+00> : vector<32xf32>
    %1 = vector.multi_reduction <add>, %0, %cst [0] : vector<8x32xf32> to vector<32xf32>
    %2 = vector.shape_cast %1 : vector<32xf32> to vector<1x32xf32>
    %cst_1 = arith.constant 1.250000e-01 : f32
    %3 = vector.broadcast %cst_1 : f32 to vector<1x32xf32>
    %4 = arith.mulf %2, %3 : vector<1x32xf32>
    %5 = vector.broadcast %4 : vector<1x32xf32> to vector<8x32xf32>
    %6 = arith.subf %0, %5 : vector<8x32xf32>
    %7 = arith.mulf %6, %6 : vector<8x32xf32>
    %cst_2 = arith.constant dense<0.000000e+00> : vector<32xf32>
    %8 = vector.multi_reduction <add>, %7, %cst_2 [0] : vector<8x32xf32> to vector<32xf32>
    %9 = vector.shape_cast %8 : vector<32xf32> to vector<1x32xf32>
    %cst_3 = arith.constant 1.250000e-01 : f32
    %10 = vector.broadcast %cst_3 : f32 to vector<1x32xf32>
    %11 = arith.mulf %9, %10 : vector<1x32xf32>
    %cst_4 = arith.constant 9.99999993E-9 : f32
    %12 = vector.broadcast %cst_4 : f32 to vector<1x32xf32>
    %13 = arith.addf %11, %12 : vector<1x32xf32>
    %14 = math.rsqrt %13 : vector<1x32xf32>
    %c0_5 = arith.constant 0 : index
    %c0_6 = arith.constant 0 : index
    %15 = vector.load %arg3[%c0_5, %c0_6] : memref<1x32xf32, #tpu.memory_space<vmem>>, vector<1x32xf32>
    %16 = arith.mulf %14, %15 : vector<1x32xf32>
    %cst_7 = arith.constant 5.000000e-01 : f32
    %17 = vector.broadcast %cst_7 : f32 to vector<1x32xf32>
    %18 = arith.mulf %17, %16 : vector<1x32xf32>
    %19 = vector.broadcast %18 : vector<1x32xf32> to vector<8x32xf32>
    %20 = arith.mulf %6, %19 : vector<8x32xf32>
    %c0_8 = arith.constant 0 : index
    %c0_9 = arith.constant 0 : index
    %21 = vector.load %arg4[%c0_8, %c0_9] : memref<1x32xf32, #tpu.memory_space<vmem>>, vector<1x32xf32>
    %cst_10 = arith.constant 5.000000e-01 : f32
    %22 = vector.broadcast %cst_10 : f32 to vector<1x32xf32>
    %23 = arith.mulf %22, %21 : vector<1x32xf32>
    %24 = vector.broadcast %23 : vector<1x32xf32> to vector<8x32xf32>
    %25 = arith.addf %20, %24 : vector<8x32xf32>
    %26 = math.tanh %25 : vector<8x32xf32>
    %c0_11 = arith.constant 0 : index
    %c0_12 = arith.constant 0 : index
    %27 = vector.load %arg2[%c0_11, %c0_12] : memref<1x32xf32, #tpu.memory_space<vmem>>, vector<1x32xf32>
    %cst_13 = arith.constant 1.000000e+00 : f32
    %28 = vector.broadcast %cst_13 : f32 to vector<1x32xf32>
    %29 = arith.addf %28, %27 : vector<1x32xf32>
    %cst_14 = arith.constant 5.000000e-01 : f32
    %30 = vector.broadcast %cst_14 : f32 to vector<1x32xf32>
    %31 = arith.mulf %30, %29 : vector<1x32xf32>
    %cst_15 = arith.constant 1.000000e+00 : f32
    %32 = vector.broadcast %cst_15 : f32 to vector<1x32xf32>
    %33 = arith.subf %32, %27 : vector<1x32xf32>
    %cst_16 = arith.constant 5.000000e-01 : f32
    %34 = vector.broadcast %cst_16 : f32 to vector<1x32xf32>
    %35 = arith.mulf %34, %33 : vector<1x32xf32>
    %36 = vector.broadcast %35 : vector<1x32xf32> to vector<8x32xf32>
    %37 = arith.mulf %36, %26 : vector<8x32xf32>
    %38 = vector.broadcast %31 : vector<1x32xf32> to vector<8x32xf32>
    %39 = arith.addf %38, %37 : vector<8x32xf32>
    %40 = arith.mulf %0, %39 : vector<8x32xf32>
    %c0_17 = arith.constant 0 : index
    %c0_18 = arith.constant 0 : index
    %41 = vector.load %arg5[%c0_17, %c0_18] : memref<8x32xf32, #tpu.memory_space<vmem>>, vector<8x32xf32>
    tpu.vector_store %arg5[%c0_17, %c0_18], %40 {strides = array<i32>} : memref<8x32xf32, #tpu.memory_space<vmem>>, vector<8x32xf32>,
    return
  }
  func.func @transform_0(%arg0: i32) -> (i32, i32) {
    %c0_i32 = arith.constant 0 : i32
    %c0_i32_0 = arith.constant 0 : i32
    return %c0_i32, %arg0 : i32, i32
  }
  func.func @transform_1(%arg0: i32) -> (i32, i32) {
    %c0_i32 = arith.constant 0 : i32
    %c0_i32_0 = arith.constant 0 : i32
    return %c0_i32, %arg0 : i32, i32
  }
  func.func @transform_2(%arg0: i32) -> (i32, i32) {
    %c0_i32 = arith.constant 0 : i32
    %c0_i32_0 = arith.constant 0 : i32
    return %c0_i32, %arg0 : i32, i32
  }
  func.func @transform_3(%arg0: i32) -> (i32, i32) {
    %c0_i32 = arith.constant 0 : i32
    %c0_i32_0 = arith.constant 0 : i32
    return %c0_i32, %arg0 : i32, i32
  }
  func.func @transform_4(%arg0: i32) -> (i32, i32) {
    %c0_i32 = arith.constant 0 : i32
    %c0_i32_0 = arith.constant 0 : i32
    return %c0_i32, %arg0 : i32, i32
  }
}

</mosaic_0001>

<bundles_post_ra>
// kernel: tpu_custom_call.1
= control target key start
LH: loop header
LB: loop body
LE: loop exit
PB: predicated region body
PF: predicated region fallthrough
CT: control target
= control target key end

     0   :  { %9 = vsyncpa [#allocation3], 0  ;;  %s223_s0 = inlined_call_operand.hbm [shape: f32[8,32], index: 0, kind: input, shape index: {}]   ;;  %s224_s1 = inlined_call_operand.vmem [shape: f32[1,32], index: 1, kind: input, shape index: {}]   ;;  %s225_s2 = inlined_call_operand.vmem [shape: f32[1,32], index: 2, kind: input, shape index: {}]   ;;  %s226_s3 = inlined_call_operand.vmem [shape: f32[1,32], index: 3, kind: input, shape index: {}]   ;;  %s227_s4 = inlined_call_operand.hbm [shape: f32[8,32], index: 4, kind: output, shape index: {}]  }
   0x1   :  { %10 = vsyncpa [#allocation4], 0  ;;  %s160_s15 = smov [#allocation2]   ;;  %s112_s19 = scalar_lea.hbm %s223_s0, 128 }
   0x2   :  { %s17_s16 = sshll.u32 %s160_s15, 4  ;;  %p113_p0 = scmp.ne.s32.totalorder %s223_s0, %s112_s19  ;;  %s18_s16 = int_to_ptr.vmem [resolvable:$true] %s17_s16 }
   0x3   :  { %p116_p1 = scmp.lt.u32.totalorder %s112_s19, %s223_s0 }
   0x5   :  { %p118_p2 = pnand %p116_p1, %p113_p0 }
   0x7   :  { %121 = shalt.err (!%p118_p2)
}
   0x8   :  { %s122_s24 = scalar_lea.vmem %s18_s16, 128  ;;  %p127_p4 = scmp.lt.s32.totalorder %s18_s16, %s18_s16 }
   0x9   :  { %p123_p3 = scmp.ne.s32.totalorder %s18_s16, %s122_s24  ;;  %p128_p5 = scmp.lt.s32.totalorder %s122_s24, %s122_s24 }
   0xb   :  { %p129_p6 = por %p128_p5, %p127_p4 }
   0xd   :  { %p130_p7 = pnand %p129_p6, %p123_p3 }
   0xf   :  { %133 = shalt.err (!%p130_p7)
}
  0x10   :  { %20 = dma.hbm_to_vmem [thread:$0]  %s223_s0, 128, %s18_s16, [#allocation3]  }
  0x11   :  { %156 = dma.done.wait [#allocation3], 128  }
  0x12   :  { %157 = vsyncadd [#allocation3], 4294967168  ;;  %vm31_vm0 = vcmask 261120   ;;  %v30_v0 = vld [vmem:[#allocation2] sm:$0xff]  ;;  %v55_v20 = vlaneseq }
  0x13   :  { %v32_v1 = vsel %vm31_vm0, %v30_v0, 0.0  ;;  %v52_v22 = vld [vmem:[%s225_s2] sm:$0x1]  ;;  %s161_s2 = smov [#allocation5]  }
  0x14   :  { %v33_v2 = vrot.slane %v32_v1, 4  ;;  %v56_v21 = vshrl.u32 %v55_v20, 7  ;;  %v60_v23 = vld [vmem:[%s226_s3] sm:$0x1]  ;;  %s97_s3 = sshll.u32 %s161_s2, 4  ;;  %s98_s3 = int_to_ptr.vmem [resolvable:$true] %s97_s3 }
  0x15   :  { %v61_v27 = vmul.f32 0.5, %v60_v23  ;;  %v70_v32 = vld [vmem:[%s224_s1] sm:$0x1]  ;;  %s134_s6 = scalar_lea.vmem %s98_s3, 128  ;;  %p139_p9 = scmp.lt.s32.totalorder %s98_s3, %s98_s3 }
  0x16   :  { %v34_v3 = vadd.f32 %v33_v2, %v32_v1  ;;  %v57_v26 = vsub.s32 0, %v56_v21  ;;  %v73_v34 = vsub.f32 1.0, %v70_v32  ;;  %v71_v35 = vadd.f32 1.0, %v70_v32  ;;  %p135_p8 = scmp.ne.s32.totalorder %s98_s3, %s134_s6  ;;  %p140_p10 = scmp.lt.s32.totalorder %s134_s6, %s134_s6 }
  0x18   :  { %v35_v4 = vrot.slane %v34_v3, 2  ;;  %v66_v30 = vrot.slane %v61_v27, %v57_v26  ;;  %v74_v36 = vmul.f32 0.5, %v73_v34  ;;  %v72_v37 = vmul.f32 0.5, %v71_v35  ;;  %p141_p11 = por %p140_p10, %p139_p9 }
  0x1a   :  { %v36_v5 = vadd.f32 %v35_v4, %v34_v3  ;;  %v79_v38 = vrot.slane %v74_v36, %v57_v26  ;;  %v86_v39 = vrot.slane %v72_v37, %v57_v26  ;;  %p142_p12 = pnand %p141_p11, %p135_p8 }
  0x1c   :  { %v37_v6 = vrot.slane %v36_v5, 1 }
  0x1e   :  { %v38_v7 = vadd.f32 %v37_v6, %v36_v5 }
  0x20   :  { %v39_v8 = vmul.f32 0.125, %v38_v7 }
  0x22   :  { %v40_v9 = vsub.f32 %v30_v0, %v39_v8 }
  0x24   :  { %v41_v10 = vmul.f32 %v40_v9, %v40_v9 }
  0x26   :  { %v42_v11 = vsel %vm31_vm0, %v41_v10, 0.0 }
  0x27   :  { %v43_v12 = vrot.slane %v42_v11, 4 }
  0x29   :  { %v44_v13 = vadd.f32 %v43_v12, %v42_v11 }
  0x2b   :  { %v45_v14 = vrot.slane %v44_v13, 2 }
  0x2d   :  { %v46_v15 = vadd.f32 %v45_v14, %v44_v13 }
  0x2f   :  { %v47_v16 = vrot.slane %v46_v15, 1 }
  0x31   :  { %v48_v17 = vadd.f32 %v47_v16, %v46_v15 }
  0x33   :  { %v49_v18 = vmul.f32 0.125, %v48_v17 }
  0x35   :  { %v50_v19 = vadd.f32 1e-08, %v49_v18 }
  0x37   :  { %108 = vrsqrt.f32 %v50_v19 }
  0x41   :  { %v109_v24 = vpop.eup %108 }
  0x42   :  { %v53_v25 = vmul.f32 %v109_v24, %v52_v22 }
  0x44   :  { %v54_v28 = vmul.f32 0.5, %v53_v25 }
  0x46   :  { %v58_v29 = vrot.slane %v54_v28, %v57_v26 }
  0x48   :  { %v59_v31 = vmul.f32 %v58_v29, %v40_v9 }
  0x4a   :  { %v68_v33 = vadd.f32 %v66_v30, %v59_v31 }
  0x4c   :  { %110 = vtanh.f32 %v68_v33 }
  0x56   :  { %v111_v40 = vpop.eup %110 }
  0x57   :  { %v81_v41 = vmul.f32 %v111_v40, %v79_v38 }
  0x59   :  { %v88_v42 = vadd.f32 %v86_v39, %v81_v41 }
  0x5b   :  { %v89_v43 = vmul.f32 %v88_v42, %v30_v0 }
  0x5d   :  { %90 = vst.msk [vmem:[#allocation5] sm:$0xff] %vm31_vm0, %v89_v43 }
  0x5e   :  { %145 = shalt.err (!%p142_p12)
}
  0x5f   :  { %s146_s8 = scalar_lea.hbm %s227_s4, 128 }
  0x60   :  { %p147_p13 = scmp.ne.s32.totalorder %s227_s4, %s146_s8  ;;  %p150_p0 = scmp.lt.u32.totalorder %s146_s8, %s227_s4 }
  0x62   :  { %p152_p1 = pnand %p150_p0, %p147_p13 }
  0x64   :  { %155 = shalt.err (!%p152_p1)
}
  0x65   :  { %100 = dma.vmem_to_hbm [thread:$0]  %s98_s3, 128, %s227_s4, [#allocation4]  }
  0x66   :  { %158 = dma.done.wait [#allocation4], 128  }
  0x67   :  { %159 = vsyncadd [#allocation4], 4294967168 }
  0x68   :  { %104 = vsyncpa [#allocation3], 1 }
  0x69   :  { %105 = vsyncpa [#allocation4], 1 }

</bundles_post_ra>
